<compile_context>
chip_gen: v7x
topology: tpu7x:2x2x1
jax: 0.10.0
libtpu: 0.0.40
codegen_flags: <defaults>
</compile_context>

<pallas_src>
import functools

import jax
import jax.numpy as jnp
from jax import lax
from jax.experimental import pallas as pl
from jax.experimental.pallas import tpu as pltpu


_LANES = 128            # lane width of a TPU vreg
_SUBLANES = 8           # sublane count of a TPU vreg
_MAX_BLOCK_ROWS = 4096  # (4096, 128) f32 block = 2 MiB per operand


def _round_up(x, m):
    return ((x + m - 1) // m) * m


# ----------------------------------------------------------------------------
# Kernel: fused diff / square / abs / per-core partial reduction
# ----------------------------------------------------------------------------
def _partial_sums_kernel(x_ref, t_ref, o_ref, *, tr, rows, blocks_per_core,
                         apply_mask):
    """Accumulates per-core partial sums of diff^2 and |diff|.

    x_ref, t_ref : (tr, 128) row blocks of the flattened operands.
    o_ref        : (1, 2, 8, 128) f32, resident across the reduction axis;
                   o_ref[0, 0] accumulates diff^2, o_ref[0, 1] accumulates |diff|.
    """
    c = pl.program_id(0)   # TensorCore split          ("parallel")
    i = pl.program_id(1)   # row-block reduction step  ("arbitrary")

    @pl.when(i == 0)
    def _init():
        o_ref[...] = jnp.zeros_like(o_ref)

    d = x_ref[...].astype(jnp.float32) - t_ref[...].astype(jnp.float32)

    if apply_mask:
        # Logical (un-clamped) block index of this step.  Rows >= `rows` are
        # either the ragged tail of the last block or belong to a fully
        # out-of-range (clamped, duplicated) step -> zero them so they
        # contribute nothing to either sum.  Pure VPU work; free while the
        # kernel is HBM-bound, and only traced in when actually required.
        blk = c * blocks_per_core + i
        row_ids = blk * tr + lax.broadcasted_iota(jnp.int32, (tr, _LANES), 0)
        d = jnp.where(row_ids < rows, d, 0.0)

    # Tree-add down to a single vreg each (pure VPU vreg adds): accumulator
    # traffic is two (8,128) stores per step, and the XLU full-reduce is left
    # for the (tiny) wrapper-side combine.
    groups = tr // _SUBLANES
    sq = jnp.sum((d * d).reshape(groups, _SUBLANES, _LANES), axis=0)
    ab = jnp.sum(jnp.abs(d).reshape(groups, _SUBLANES, _LANES), axis=0)
    o_ref[0, 0] += sq
    o_ref[0, 1] += ab


# ----------------------------------------------------------------------------
# Wrapper
# ----------------------------------------------------------------------------
def _prep_operand(arr):
    """Flatten to a lane-dense (rows, 128) view.

    If the element count is a multiple of 128 (the realistic case) this is a
    pure reshape: zero extra HBM traffic.  Otherwise only a tiny zero slab
    (<128 elements; <1024 for sub-vreg inputs) is appended — zeros are exact
    no-ops for both reductions.  Never pads the whole array to the block size.
    """
    flat = arr.reshape(-1)
    n = flat.size
    padded = max(_round_up(n, _LANES), _SUBLANES * _LANES)
    if padded != n:
        flat = jnp.concatenate([flat, jnp.zeros((padded - n,), flat.dtype)])
    return flat.reshape(-1, _LANES)


def _scaled_mse_2d(x2, t2, eps):
    """Runs the fused kernel on pre-prepped (rows, 128) operands."""
    assert x2.shape == t2.shape and x2.shape[1] == _LANES, (x2.shape, t2.shape)
    rows = x2.shape[0]

    # Row-block size: multiple of 8 (sublane), never larger than the array,
    # capped at 2 MiB/operand.  Working set (2 operands x 2 pipeline buffers)
    # stays <= ~16 MiB, fitting the scoped-VMEM budget on v5e/v6e (128 MiB
    # physical) and v7x (64 MiB) alike — no generation-specific tiling needed.
    tr = min(_MAX_BLOCK_ROWS, (rows // _SUBLANES) * _SUBLANES)
    nblocks = pl.cdiv(rows, tr)
    blocks_per_core = pl.cdiv(nblocks, 2)     # leading grid axis = 2 cores
    # Masking is only traced in when some step can see out-of-range rows
    # (ragged last block, or a clamped duplicate step when nblocks is odd).
    apply_mask = (rows % tr != 0) or (2 * blocks_per_core != nblocks)

    def block_index(c, i):
        # Clamp so the DMA never starts past the end of the array; the kernel
        # zeroes the (duplicated) contribution of clamped steps.
        return (jnp.minimum(c * blocks_per_core + i, nblocks - 1), 0)

    kernel = functools.partial(_partial_sums_kernel, tr=tr, rows=rows,
                               blocks_per_core=blocks_per_core,
                               apply_mask=apply_mask)

    parts = pl.pallas_call(
        kernel,
        out_shape=jax.ShapeDtypeStruct((2, 2, _SUBLANES, _LANES), jnp.float32),
        grid=(2, blocks_per_core),
        in_specs=[
            pl.BlockSpec((tr, _LANES), block_index),
            pl.BlockSpec((tr, _LANES), block_index),
        ],
        out_specs=pl.BlockSpec((1, 2, _SUBLANES, _LANES),
                               lambda c, i: (c, 0, 0, 0)),
        compiler_params=pltpu.CompilerParams(
            # axis 0: independent halves -> sharded across TensorCores on v7x;
            # axis 1: sequential reduction with a resident output accumulator.
            dimension_semantics=("parallel", "arbitrary"),
            vmem_limit_bytes=32 * 1024 * 1024,   # safe on v5e/v6e/v7x, >> need
        ),
    )(x2, t2)

    # Tiny wrapper-side combine: 2 cores x (8,128) partials -> scalars + divide.
    sq_sum = jnp.sum(parts[:, 0])
    abs_sum = jnp.sum(parts[:, 1])
    return sq_sum / (abs_sum + jnp.float32(eps))


def scaled_mse_loss(inp, target, *, eps=1e-8):
    """ScaledMSELoss.forward: sum(diff^2) / (sum(|diff|) + eps). f32 scalar."""
    assert inp.shape == target.shape, (inp.shape, target.shape)
    return _scaled_mse_2d(_prep_operand(inp), _prep_operand(target), eps)


def make_content_loss(target, eps=1e-8):
    """Mirror of ContentLoss(target): returns loss_fn(input).

    The constant target is flattened / prepped exactly once here, not per call.
    """
    t2 = _prep_operand(target)
    t_shape = target.shape

    def loss_fn(inp):
        assert inp.shape == t_shape, (inp.shape, t_shape)
        return _scaled_mse_2d(_prep_operand(inp), t2, eps)

    return loss_fn


# ----------------------------------------------------------------------------
# Pure-JAX reference
# ----------------------------------------------------------------------------
def scaled_mse_loss_ref(inp, target, eps=1e-8):
    d = inp.astype(jnp.float32) - target.astype(jnp.float32)
    return jnp.sum(d * d) / (jnp.sum(jnp.abs(d)) + eps)


if __name__ == "__main__":
    key = jax.random.PRNGKey(0)
    eps = 1e-8

    test_shapes = [
        (2, 4, 16, 16),     # tiny, 128-aligned: zero-copy path, single block
        (3, 5, 17, 13),     # odd element count: tiny (<128) tail-slab path
        (4, 64, 32, 32),    # aligned, single 2048-row block
        (2, 6, 256, 512),   # 3 row blocks (odd) -> clamped/masked dual-core split
        (4, 128, 64, 64),   # 4 row blocks (even) -> unmasked fast path, both cores
    ]

    for shape in test_shapes:
        key, k1, k2 = jax.random.split(key, 3)
        x = jax.random.normal(k1, shape, jnp.float32)
        tgt = jax.random.normal(k2, shape, jnp.float32)

        loss_fn = make_content_loss(tgt, eps=eps)   # ContentLoss(target)
        got = loss_fn(x)                            # .forward(input)
        jax.block_until_ready(got)

        want = scaled_mse_loss_ref(x, tgt, eps=eps)
        assert got.shape == want.shape == (), (got.shape, want.shape)
        assert jnp.allclose(got, want, rtol=1e-4, atol=1e-6), (
            shape, float(got), float(want))

    print("KERNEL_OK")
</pallas_src>

<mosaic_0001>
module attributes {stable_mosaic.version = 11 : i64} {
  func.func @_partial_sums_kernel(%arg0: i32, %arg1: i32, %arg2: memref<16x128xf32, #tpu.memory_space<vmem>>, %arg3: memref<16x128xf32, #tpu.memory_space<vmem>>, %arg4: memref<1x2x8x128xf32, #tpu.memory_space<vmem>>) attributes {dimension_semantics = [#tpu.dimension_semantics<parallel>, #tpu.dimension_semantics<arbitrary>], iteration_bounds = array<i64: 2, 1>, scalar_prefetch = 0 : i64, scratch_operands = 0 : i64, tpu.core_type = #tpu.core_type<tc>, window_params = [{transform_indices = @transform_0, window_bounds = array<i64: 16, 128>}, {transform_indices = @transform_1, window_bounds = array<i64: 16, 128>}, {transform_indices = @transform_2, window_bounds = array<i64: 1, 2, 8, 128>}]} {
    %c0_i32 = arith.constant 0 : i32
    %0 = arith.cmpi eq, %arg1, %c0_i32 : i32
    %1 = arith.extui %0 : i1 to i32
    %c0_i32_0 = arith.constant 0 : i32
    %2 = arith.cmpi ne, %1, %c0_i32_0 : i32
    scf.if %2 {
      %cst_22 = arith.constant 0.000000e+00 : f32
      %34 = vector.broadcast %cst_22 : f32 to vector<1x2x8x128xf32>
      %c0_23 = arith.constant 0 : index
      %c0_24 = arith.constant 0 : index
      %c0_25 = arith.constant 0 : index
      %c0_26 = arith.constant 0 : index
      %35 = vector.load %arg4[%c0_23, %c0_24, %c0_25, %c0_26] : memref<1x2x8x128xf32, #tpu.memory_space<vmem>>, vector<1x2x8x128xf32>
      tpu.vector_store %arg4[%c0_23, %c0_24, %c0_25, %c0_26], %34 {strides = array<i32>} : memref<1x2x8x128xf32, #tpu.memory_space<vmem>>, vector<1x2x8x128xf32>,
    } else {
    }
    %c0 = arith.constant 0 : index
    %c0_1 = arith.constant 0 : index
    %3 = vector.load %arg2[%c0, %c0_1] : memref<16x128xf32, #tpu.memory_space<vmem>>, vector<16x128xf32>
    %c0_2 = arith.constant 0 : index
    %c0_3 = arith.constant 0 : index
    %4 = vector.load %arg3[%c0_2, %c0_3] : memref<16x128xf32, #tpu.memory_space<vmem>>, vector<16x128xf32>
    %5 = arith.subf %3, %4 : vector<16x128xf32>
    %c1_i32 = arith.constant 1 : i32
    %6 = arith.muli %arg0, %c1_i32 : i32
    %7 = arith.addi %6, %arg1 : i32
    %c16_i32 = arith.constant 16 : i32
    %8 = arith.muli %7, %c16_i32 : i32
    %9 = tpu.iota {dimensions = array<i32: 0>} : vector<16x128xi32>
    %10 = vector.broadcast %8 : i32 to vector<16x128xi32>
    %11 = arith.addi %10, %9 : vector<16x128xi32>
    %c16_i32_4 = arith.constant 16 : i32
    %12 = vector.broadcast %c16_i32_4 : i32 to vector<16x128xi32>
    %13 = arith.cmpi slt, %11, %12 : vector<16x128xi32>
    %cst = arith.constant 0.000000e+00 : f32
    %14 = vector.broadcast %cst : f32 to vector<16x128xf32>
    %15 = arith.select %13, %5, %14 : vector<16x128xi1>, vector<16x128xf32>
    %16 = arith.mulf %15, %15 : vector<16x128xf32>
    %17 = vector.shape_cast %16 : vector<16x128xf32> to vector<2x8x128xf32>
    %cst_5 = arith.constant dense<0.000000e+00> : vector<8x128xf32>
    %18 = vector.multi_reduction <add>, %17, %cst_5 [0] : vector<2x8x128xf32> to vector<8x128xf32>
    %19 = math.absf %15 : vector<16x128xf32>
    %20 = vector.shape_cast %19 : vector<16x128xf32> to vector<2x8x128xf32>
    %cst_6 = arith.constant dense<0.000000e+00> : vector<8x128xf32>
    %21 = vector.multi_reduction <add>, %20, %cst_6 [0] : vector<2x8x128xf32> to vector<8x128xf32>
    %c0_7 = arith.constant 0 : index
    %c0_8 = arith.constant 0 : index
    %c0_9 = arith.constant 0 : index
    %c0_10 = arith.constant 0 : index
    %22 = vector.load %arg4[%c0_7, %c0_8, %c0_9, %c0_10] : memref<1x2x8x128xf32, #tpu.memory_space<vmem>>, vector<1x1x8x128xf32>
    %23 = vector.shape_cast %22 : vector<1x1x8x128xf32> to vector<8x128xf32>
    %24 = arith.addf %23, %18 : vector<8x128xf32>
    %c0_11 = arith.constant 0 : index
    %c0_12 = arith.constant 0 : index
    %c0_13 = arith.constant 0 : index
    %c0_14 = arith.constant 0 : index
    %25 = vector.load %arg4[%c0_11, %c0_12, %c0_13, %c0_14] : memref<1x2x8x128xf32, #tpu.memory_space<vmem>>, vector<1x1x8x128xf32>
    %26 = vector.shape_cast %25 : vector<1x1x8x128xf32> to vector<8x128xf32>
    %27 = vector.shape_cast %24 : vector<8x128xf32> to vector<1x1x8x128xf32>
    tpu.vector_store %arg4[%c0_11, %c0_12, %c0_13, %c0_14], %27 {strides = array<i32>} : memref<1x2x8x128xf32, #tpu.memory_space<vmem>>, vector<1x1x8x128xf32>,
    %c0_15 = arith.constant 0 : index
    %c1 = arith.constant 1 : index
    %c0_16 = arith.constant 0 : index
    %c0_17 = arith.constant 0 : index
    %28 = vector.load %arg4[%c0_15, %c1, %c0_16, %c0_17] : memref<1x2x8x128xf32, #tpu.memory_space<vmem>>, vector<1x1x8x128xf32>
    %29 = vector.shape_cast %28 : vector<1x1x8x128xf32> to vector<8x128xf32>
    %30 = arith.addf %29, %21 : vector<8x128xf32>
    %c0_18 = arith.constant 0 : index
    %c1_19 = arith.constant 1 : index
    %c0_20 = arith.constant 0 : index
    %c0_21 = arith.constant 0 : index
    %31 = vector.load %arg4[%c0_18, %c1_19, %c0_20, %c0_21] : memref<1x2x8x128xf32, #tpu.memory_space<vmem>>, vector<1x1x8x128xf32>
    %32 = vector.shape_cast %31 : vector<1x1x8x128xf32> to vector<8x128xf32>
    %33 = vector.shape_cast %30 : vector<8x128xf32> to vector<1x1x8x128xf32>
    tpu.vector_store %arg4[%c0_18, %c1_19, %c0_20, %c0_21], %33 {strides = array<i32>} : memref<1x2x8x128xf32, #tpu.memory_space<vmem>>, vector<1x1x8x128xf32>,
    return
  }
  func.func @transform_0(%arg0: i32, %arg1: i32) -> (i32, i32) {
    %c1_i32 = arith.constant 1 : i32
    %0 = arith.muli %arg0, %c1_i32 : i32
    %1 = arith.addi %0, %arg1 : i32
    %c0_i32 = arith.constant 0 : i32
    %2 = arith.minsi %1, %c0_i32 : i32
    %c0_i32_0 = arith.constant 0 : i32
    %c0_i32_1 = arith.constant 0 : i32
    return %2, %c0_i32_0 : i32, i32
  }
  func.func @transform_1(%arg0: i32, %arg1: i32) -> (i32, i32) {
    %c1_i32 = arith.constant 1 : i32
    %0 = arith.muli %arg0, %c1_i32 : i32
    %1 = arith.addi %0, %arg1 : i32
    %c0_i32 = arith.constant 0 : i32
    %2 = arith.minsi %1, %c0_i32 : i32
    %c0_i32_0 = arith.constant 0 : i32
    %c0_i32_1 = arith.constant 0 : i32
    return %2, %c0_i32_0 : i32, i32
  }
  func.func @transform_2(%arg0: i32, %arg1: i32) -> (i32, i32, i32, i32) {
    %c0_i32 = arith.constant 0 : i32
    %c0_i32_0 = arith.constant 0 : i32
    %c0_i32_1 = arith.constant 0 : i32
    %c0_i32_2 = arith.constant 0 : i32
    return %arg0, %c0_i32, %c0_i32_0, %c0_i32_1 : i32, i32, i32, i32
  }
}

</mosaic_0001>

<bundles_post_ra>
// kernel: tpu_custom_call.1
= control target key start
LH: loop header
LB: loop body
LE: loop exit
PB: predicated region body
PF: predicated region fallthrough
CT: control target
= control target key end

     0   :  { %7 = vsyncpa [#allocation3], 0  ;;  %s914_s0 = inlined_call_operand.hbm [shape: f32[16,128], index: 0, kind: input, shape index: {}]   ;;  %s915_s1 = inlined_call_operand.hbm [shape: f32[16,128], index: 1, kind: input, shape index: {}]   ;;  %s916_s2 = inlined_call_operand.hbm [shape: f32[2,2,8,128], index: 2, kind: output, shape index: {}]  }
   0x1   :  { %9 = vsyncpa [#allocation3 + $0x1], 0 }
   0x2   :  { %10 = vsyncpa [#allocation6], 0 }
   0x3   :  { %12 = vsyncpa [#allocation6 + $0x1], 0 }
   0x4   :  { %13 = vsyncpa [#allocation4], 0 }
   0x5   :  { %15 = vsyncpa [#allocation4 + $0x1], 0  ;;  %s707_s9 = smov 0   ;;  %s709_s10 = smov 0  }
   0x6   :  { %s711_s11 = smov 0   ;;  %s713_s12 = smov 0  }
   0x7   :  { %s715_s13 = smov 0   ;;  %s717_s14 = smov 0  }
   0x8   :  { %s719_s15 = smov 0   ;;  %s721_s16 = smov 0  }
   0x9 LB: > { %s395_s17 = sadd.s32 4294967295, %s683_s16   ;;  %s396_s18 = sadd.s32 4294967294, %s683_s16   ;;  %s683_s16 = sphi %s721_s16, %s21_s16   ;;  %s679_s15 = sphi %s719_s15, %s935_s15   ;;  %s675_s14 = sphi %s717_s14, %s934_s14   ;;  %s671_s13 = sphi %s715_s13, %s904_s13   ;;  %s667_s12 = sphi %s713_s12, %s933_s12   ;;  %s663_s11 = sphi %s711_s11, %s932_s11   ;;  %s659_s10 = sphi %s709_s10, %s931_s10   ;;  %s655_s9 = sphi %s707_s9, %s930_s9  }
   0xa   : > { %s33_s19 = sadd.s32 1, %s679_s15  ;;  %p652_p1 = scmp.ne.s32.totalorder %s671_s13, 0 }
   0xb   : > { %p35_p0 = scmp.ge.s32.totalorder %s33_s19, 2  ;;  %p54_p2 = scmp.eq.s32.totalorder %s683_s16, 0 }
   0xc   : > { %p59_p3 = scmp.ne.s32.totalorder %s671_s13, %s667_s12  ;;  %p60_p5 = scmp.eq.s32.totalorder %s395_s17, 0 }
   0xd   : > { %s937_s19 = smov (%p35_p0, %s33_s19), 0  ;;  %p753_p4 = por %p652_p1, %p54_p2 }
   0xe   : > { %p757_p6 = por %p60_p5, %p59_p3  ;;  %s101_s22 = ssub.s32 %s679_s15, %s937_s19 }
   0xf   : > { %p102_p7 = scmp.eq.s32.totalorder %s101_s22, 0  ;;  %s104_s23 = sadd.s32 1, %s663_s11 }
  0x10   : > { %s920_s21 = scalar_select %p757_p6, 1, 0 }
  0x11   : > { %s765_s24 = scalar_select %p102_p7, %s663_s11, %s104_s23  }
  0x12   : > { %p114_p8 = scmp.ne.s32.totalorder %s663_s11, %s659_s10  ;;  %p115_p9 = scmp.eq.s32.totalorder %s395_s17, 1 }
  0x13   : > { %p120_p10 = scmp.ne.s32.totalorder %s659_s10, %s655_s9  ;;  %p121_p11 = scmp.eq.s32.totalorder %s396_s18, 1 }
  0x14   : > { %p771_p12 = por %p115_p9, %p114_p8  ;;  %p437_p1 = scmp.lt.s32.totalorder %s683_s16, 2 }
  0x15   : > { %p776_p0 = por %p121_p11, %p120_p10  ;;  %s685_s27 = smov [#allocation2]  }
  0x16   : > { %s921_s25 = scalar_select %p771_p12, 1, 0 }
  0x17   : > { %s922_s26 = scalar_select %p776_p0, 1, 0 }
  0x18   : > { %s155_s28 = sshll.u32 %s685_s27, 4  ;;  %p783_p2 = pnand %p437_p1, %p753_p4  ;;  %s156_s28 = int_to_ptr.vmem [resolvable:$true] %s155_s28 }
  0x19   : > { %s516_s4 = scalar_lea.hbm %s914_s0, 256 }
  0x1a   : > { %p517_p3 = scmp.ne.s32.totalorder %s914_s0, %s516_s4  ;;  %p518_p5 = pneg %p783_p2 }
  0x1b   : > { %p523_p8 = scmp.lt.u32.totalorder %s516_s4, %s516_s4  ;;  %p525_p9 = scmp.lt.u32.totalorder %s516_s4, %s914_s0 }
  0x1c   : > { %p519_p7 = pnand %p518_p5, %p517_p3 }
  0x1d   : > { %p526_p10 = por %p525_p9, %p523_p8 }
  0x1e   : > { %p520_p4 = pneg %p519_p7 }
  0x20   : > { %p527_p11 = pnand %p526_p10, %p520_p4 }
  0x22   : > { %530 = shalt.err (!%p527_p11)
}
  0x23   : > { %s531_s12 = scalar_lea.vmem %s156_s28, 256  ;;  %s538_s17 = scalar_lea.vmem %s156_s28, 512 }
  0x24   : > { %p532_p1 = scmp.ne.s32.totalorder %s156_s28, %s531_s12  ;;  %p539_p12 = scmp.lt.s32.totalorder %s156_s28, %s156_s28 }
  0x25   : > { %p540_p6 = scmp.lt.s32.totalorder %s538_s17, %s531_s12 }
  0x26   : > { %p534_p13 = pnand %p532_p1, %p518_p5 }
  0x27   : > { %p541_p3 = por %p540_p6, %p539_p12 }
  0x28   : > { %p535_p0 = pneg %p534_p13 }
  0x2a   : > { %p542_p7 = pnand %p541_p3, %p535_p0 }
  0x2c   : > { %545 = shalt.err (!%p542_p7)
}
  0x2d   : > { %s686_s18 = smov 128   ;;  %s687_s20 = smov 8  }
  0x2e   : > { %429 = dma.hbm_to_vmem [thread:$0]  (!%p783_p2), %s914_s0, 256, %s156_s28, [#allocation3], %s686_s18, %s686_s18, %s687_s20  }
  0x2f   : > { %p405_p13 = scmp.ge.s32.totalorder %s683_s16, 1  ;;  %p187_p4 = scmp.lt.s32.totalorder %s683_s16, 3 }
  0x30   : > { %s688_s30 = smov [#allocation5]   ;;  %s546_s6 = scalar_lea.hbm %s915_s1, 256 }
  0x31   : > { %p814_p8 = pnand %p405_p13, %p187_p4  ;;  %s179_s3 = sshll.u32 %s688_s30, 4  ;;  %s180_s3 = int_to_ptr.vmem [resolvable:$true] %s179_s3 }
  0x32   : > { %p547_p6 = scmp.ne.s32.totalorder %s915_s1, %s546_s6  ;;  %p553_p9 = scmp.lt.u32.totalorder %s546_s6, %s546_s6 }
  0x33   : > { %s924_s27 = scalar_select %p814_p8, 1, 0 }
  0x34   : > { %p549_p12 = pnand %p547_p6, %p518_p5  ;;  %p555_p10 = scmp.lt.u32.totalorder %s546_s6, %s915_s1 }
  0x36   : > { %p550_p0 = pneg %p549_p12  ;;  %p556_p11 = por %p555_p10, %p553_p9 }
  0x38   : > { %p557_p1 = pnand %p556_p11, %p550_p0 }
  0x3a   : > { %560 = shalt.err (!%p557_p1)
}
  0x3b   : > { %s561_s17 = scalar_lea.vmem %s180_s3, 256  ;;  %s568_s22 = scalar_lea.vmem %s180_s3, 512 }
  0x3c   : > { %p562_p3 = scmp.ne.s32.totalorder %s180_s3, %s561_s17  ;;  %p569_p4 = scmp.lt.s32.totalorder %s180_s3, %s180_s3 }
  0x3d   : > { %p570_p8 = scmp.lt.s32.totalorder %s568_s22, %s561_s17 }
  0x3e   : > { %p564_p7 = pnand %p562_p3, %p518_p5 }
  0x3f   : > { %p571_p6 = por %p570_p8, %p569_p4 }
  0x40   : > { %p565_p13 = pneg %p564_p7 }
  0x42   : > { %p572_p12 = pnand %p571_p6, %p565_p13 }
  0x44   : > { %575 = shalt.err (!%p572_p12)
}
  0x45   : > { %432 = dma.hbm_to_vmem [thread:$0]  (!%p783_p2), %s915_s1, 256, %s180_s3, [#allocation6], %s686_s18, %s686_s18, %s687_s20  }
  0x46   : > { %p925_p0 = scmp.ne.s32.totalorder %s924_s27, 0 }
  0x47   : > { %s193_s4 = sand.u32 (!%p925_p0), 1, %s671_s13   ;;  %p926_p5 = scmp.ne.s32.totalorder (!%p925_p0), %s920_s21, 0 }
  0x48   : > { %191 = sbr.rel (%p925_p0) target bundleno = 111 (0x6f), region = 28  ;;  %s406_s5 = sshll.u32 (!%p925_p0), %s193_s4, 4 }
  0x49   : > { %s194_s6 = scalar_lea.sflag (!%p925_p0), [#allocation3], %s193_s4  ;;  %s197_s7 = scalar_lea.vmem (!%p925_p0), [#allocation2], %s406_s5 }
  0x4f   : > { %641 = dma.done.wait (%p926_p5), %s194_s6, 256  }
  0x50   : > { %643 = vsyncadd (%p926_p5), %s194_s6, 4294967040  ;;  %s203_s29 = scalar_lea.sflag [#allocation6], %s193_s4  ;;  %s206_s8 = scalar_lea.vmem [#allocation5], %s406_s5 }
  0x51   : > { %645 = dma.done.wait (%p926_p5), %s203_s29, 256  }
  0x52   : > { %647 = vsyncadd (%p926_p5), %s203_s29, 4294967040  ;;  %s409_s18 = sshll.u32 %s675_s14, 4  ;;  %v254_v0 = vlaneseq  ;;  %s229_s20 = sand.u32 1, %s659_s10   ;;  %v246_v6 = vld [vmem:[%s197_s7] sm:$0xff]  ;;  %v247_v7 = vld [vmem:[%s197_s7 + $0x8] sm:$0xff] }
  0x53   : > { %v257_v1 = vstv %s409_s18  ;;  %s408_s27 = sshll.u32 %s229_s20, 4  ;;  %v248_v8 = vld [vmem:[%s206_s8] sm:$0xff]  ;;  %v249_v9 = vld [vmem:[%s206_s8 + $0x8] sm:$0xff]  ;;  %s419_s21 = sshll.u32 %s675_s14, 8 }
  0x54   : > { %v255_v2 = vshrl.u32 %v254_v0, 7  ;;  %v250_v10 = vsub.f32 %v246_v6, %v248_v8  ;;  %v251_v11 = vsub.f32 %v247_v7, %v249_v9  ;;  %s231_s3 = scalar_lea.vmem [#allocation7], %s408_s27  ;;  %s858_s22 = scalar_lea.hbm %s916_s2, %s419_s21 }
  0x55   : > { %s291_s28 = sshll.u32 %s231_s3, 4  ;;  %s862_s23 = scalar_lea.sflag [#allocation4], %s229_s20  ;;  %s860_s28 = int_to_ptr.vmem [resolvable:$true] %s291_s28 }
  0x56   : > { %v256_v3 = vadd.s32 8, %v255_v2  ;;  %v258_v4 = vadd.s32 %v257_v1, %v255_v2  ;;  %s576_s30 = scalar_lea.vmem %s860_s28, 256  ;;  %p927_p8 = scmp.ne.s32.totalorder %s921_s25, 0 }
  0x57   : > { %p577_p2 = scmp.ne.s32.totalorder %s860_s28, %s576_s30  ;;  %s689_s14 = smov [#allocation7]  }
  0x58   : > { %v259_v5 = vadd.s32 %v257_v1, %v256_v3  ;;  %vm260_vm0 = vcmp.lt.s32.totalorder %v258_v4, 16  ;;  %s580_s4 = sshll.u32 %s689_s14, 4  ;;  %s581_s4 = int_to_ptr.vmem [resolvable:$false] %s580_s4 }
  0x59   : > { %v262_v12 = vsel %vm260_vm0, %v250_v10, 0.0  ;;  %p578_p9 = pnand %p577_p2, %p927_p8  ;;  %s582_s5 = scalar_lea.vmem %s581_s4, 512 }
  0x5a   : > { %vm261_vm1 = vcmp.lt.s32.totalorder %v259_v5, 16  ;;  %v264_v14 = vmul.f32 %v262_v12, %v262_v12  ;;  %v267_v15 = vand.u32 2147483647, %v262_v12  ;;  %p583_p11 = scmp.lt.s32.totalorder %s860_s28, %s581_s4  ;;  %p584_p1 = scmp.lt.s32.totalorder %s582_s5, %s576_s30 }
  0x5b   : > { %v263_v13 = vsel %vm261_vm1, %v251_v11, 0.0  ;;  %p579_p10 = pneg %p578_p9 }
  0x5c   : > { %v265_v16 = vmul.f32 %v263_v13, %v263_v13  ;;  %v268_v17 = vand.u32 2147483647, %v263_v13  ;;  %p585_p3 = por %p584_p1, %p583_p11 }
  0x5e   : > { %v266_v18 = vadd.f32 %v265_v16, %v264_v14  ;;  %v269_v19 = vadd.f32 %v268_v17, %v267_v15  ;;  %p586_p7 = pnand %p585_p3, %p579_p10 }
  0x60   : > { %272 = vst [vmem:[%s231_s3] sm:$0xff] %v266_v18  ;;  %411 = vst [vmem:[%s231_s3 + $0x8] sm:$0xff] %v269_v19 }
  0x61   : > { %589 = shalt.err (!%p586_p7)
}
  0x62   : > { %s590_s6 = scalar_lea.hbm %s858_s22, 256  ;;  %s594_s8 = scalar_lea.hbm %s916_s2, 512 }
  0x63   : > { %p591_p13 = scmp.ne.s32.totalorder %s858_s22, %s590_s6  ;;  %p595_p12 = scmp.lt.u32.totalorder %s858_s22, %s916_s2 }
  0x64   : > { %p596_p0 = scmp.lt.u32.totalorder %s594_s8, %s590_s6  ;;  %p598_p2 = scmp.lt.u32.totalorder %s590_s6, %s858_s22 }
  0x65   : > { %p592_p4 = pnand %p591_p13, %p927_p8 }
  0x66   : > { %p597_p5 = por %p596_p0, %p595_p12 }
  0x67   : > { %p593_p6 = pneg %p592_p4 }
  0x68   : > { %p599_p9 = por %p598_p2, %p597_p5 }
  0x6a   : > { %p600_p10 = pnand %p599_p9, %p593_p6 }
  0x6c   : > { %603 = shalt.err (!%p600_p10)
}
  0x6d   : > { %s690_s27 = smov 128   ;;  %s691_s21 = smov 8  }
  0x6e   : > { %424 = dma.vmem_to_hbm [thread:$0]  (%p927_p8), %s860_s28, 256, %s858_s22, %s862_s23, %s690_s27, %s690_s27, %s691_s21  }
  0x6f PF: > { %s306_s3 = sand.u32 1, %s655_s9   ;;  %p928_p11 = scmp.ne.s32.totalorder %s922_s26, 0 }
  0x70   : > { %p929_p1 = scmp.ge.s32.totalorder %s683_s16, 2  ;;  %s307_s12 = scalar_lea.sflag [#allocation4], %s306_s3 }
  0x72   : > { %p434_p3 = pnand %p929_p1, %p928_p11 }
  0x74   : > { %649 = dma.done.wait (!%p434_p3), %s307_s12, 256  }
  0x75   : > { %651 = vsyncadd (!%p434_p3), %s307_s12, 4294967040  ;;  %s21_s16 = sadd.s32 1, %s683_s16   ;;  %s930_s9 = smov %s659_s10 }
  0x76   : > { %p18_p7 = scmp.ge.s32.totalorder %s21_s16, 4   ;;  %s931_s10 = smov %s663_s11 }
  0x77   : > { %s932_s11 = smov %s765_s24  ;;  %s933_s12 = smov %s671_s13 }
  0x78   : > { %s904_s13 = smov 0   ;;  %s934_s14 = smov %s679_s15 }
  0x79   : > { %s935_s15 = smov %s937_s19  ;;  %20 = sbr.rel (!%p18_p7) target bundleno = 9 (0x9), region = 91 }
  0x80   :  { %312 = vsyncpa [#allocation3], 1 }
  0x81   :  { %314 = vsyncpa [#allocation3 + $0x1], 1 }
  0x82   :  { %315 = vsyncpa [#allocation6], 1 }
  0x83   :  { %317 = vsyncpa [#allocation6 + $0x1], 1 }
  0x84   :  { %318 = vsyncpa [#allocation4], 1 }
  0x85   :  { %320 = vsyncpa [#allocation4 + $0x1], 1 }

</bundles_post_ra>
